<compile_context>
chip_gen: v5e
topology: v5e:2x2
jax: 0.10.0
libtpu: 0.0.40
codegen_flags: <defaults>
</compile_context>

<pallas_src>
import jax
import jax.numpy as jnp
from jax.experimental import pallas as pl
from jax.experimental.pallas import tpu as pltpu

_LANE = 128


def _cdiv(a, b):
    return -(-a // b)


def _round_up(a, b):
    return _cdiv(a, b) * b


def _tpu_params():
    """(tensorcores_per_chip, vmem_capacity_bytes) with safe fallbacks."""
    n_cores = 1
    vmem_cap = 64 * 1024 * 1024            # conservative default
    try:
        info = pltpu.get_tpu_info()
        cap = int(getattr(info, "vmem_capacity_bytes", 0) or 0)
        if cap > 0:
            vmem_cap = cap
        ver = getattr(info, "chip_version", None)
        name = str(getattr(ver, "name", ver)).lower()
        if "7" in name:                    # v7x-class: 2 TensorCores per chip
            n_cores = 2
    except Exception:
        pass
    return n_cores, max(vmem_cap, 32 * 1024 * 1024)


def _plan(S, n_cores, cap_elems):
    """Pick (n_cores, tile_s, blocks_per_core).

    Guarantees: tile_s is a multiple of 128 (or equals the full dim S),
    tile_s <= S, tile_s <= cap_elems, and no grid block is fully out of the
    [0, S) range (only the globally-last block may be partial)."""
    if n_cores > 1:
        tile = min(cap_elems, _round_up(_cdiv(S, n_cores), _LANE))
        bpc = _cdiv(_cdiv(S, tile), n_cores)
        G = n_cores * bpc
        tile = min(tile, _round_up(_cdiv(S, G), _LANE))   # avoid empty blocks
        if (G - 1) * tile < S and tile <= S:
            return n_cores, tile, bpc
        n_cores = 1                                       # degenerate: tiny S
    if S <= cap_elems:
        return 1, S, 1                # single full-dim block, never ragged
    return 1, cap_elems, _cdiv(S, cap_elems)


def _make_kernel(*, S, tile_s, bpc, n_cores, ragged):
    def kernel(p_ref, g_ref, gsum_ref, num_ref, psum_ref):
        if n_cores > 1:
            c = pl.program_id(0)
            s = pl.program_id(1)
        else:
            c = 0
            s = pl.program_id(0)

        @pl.when(s == 0)
        def _():
            gsum_ref[...] = jnp.zeros_like(gsum_ref)
            num_ref[...] = jnp.zeros_like(num_ref)
            psum_ref[...] = jnp.zeros_like(psum_ref)

        p = p_ref[...].astype(jnp.float32)                 # (BC, tile_s)
        g = g_ref[...].astype(jnp.float32)

        if ragged:
            # Pallas does not zero out-of-bounds block contents; mask them.
            # Only the globally-last block is ever partial, but the mask is
            # all-true elsewhere and its few VPU ops hide under the DMA.
            start = (c * bpc + s) * tile_s
            lane = jax.lax.broadcasted_iota(jnp.int32, p.shape, 1)
            valid = lane < (S - start)
            p = jnp.where(valid, p, 0.0)
            g = jnp.where(valid, g, 0.0)

        gsum_ref[...] += jnp.sum(g, axis=-1, keepdims=True)      # sum(g)
        num_ref[...] += jnp.sum(p * g, axis=-1, keepdims=True)   # sum(p*g)
        psum_ref[...] += jnp.sum(p, axis=-1, keepdims=True)      # sum(p)

    return kernel


def _sums_pallas(p_f, g_f, *, BC, S, n_cores, vmem_cap, max_tile_elems=None):
    """Per-(b,c) streaming sums: returns (sum(g), sum(p*g), sum(p)) as (BC,)."""
    itemsize = max(jnp.dtype(p_f.dtype).itemsize, jnp.dtype(g_f.dtype).itemsize)

    # Largest 128-multiple tile s.t. 2 inputs x 2 pipeline buffers fit ~1/4 VMEM.
    budget = vmem_cap // 4
    cap_elems = max(_LANE, (budget // (4 * BC * itemsize)) // _LANE * _LANE)
    if max_tile_elems is not None:                      # test hook (ragged path)
        cap_elems = max(_LANE, min(cap_elems, (max_tile_elems // _LANE) * _LANE))

    n_cores, tile_s, bpc = _plan(S, n_cores, cap_elems)
    grid_blocks = n_cores * bpc
    ragged = (grid_blocks * tile_s != S)

    kernel = _make_kernel(S=S, tile_s=tile_s, bpc=bpc, n_cores=n_cores,
                          ragged=ragged)

    # VMEM request: double-buffered input tiles (+ f32 upcast temps if narrow).
    tile_bytes_in = BC * tile_s * itemsize
    need = 4 * tile_bytes_in + 2 * 1024 * 1024
    if itemsize < 4:
        need += 2 * BC * tile_s * 4
    vmem_limit = int(min(max(need, 8 * 1024 * 1024), (vmem_cap * 3) // 5))

    if n_cores > 1:
        grid = (n_cores, bpc)
        in_spec = pl.BlockSpec((BC, tile_s), lambda c, s: (0, c * bpc + s))
        acc_shape = jax.ShapeDtypeStruct((n_cores, BC, 1), jnp.float32)
        acc_spec = pl.BlockSpec((None, BC, 1), lambda c, s: (c, 0, 0))
        dim_sems = (pltpu.CORE_PARALLEL, pltpu.ARBITRARY)
    else:
        grid = (bpc,)
        in_spec = pl.BlockSpec((BC, tile_s), lambda s: (0, s))
        acc_shape = jax.ShapeDtypeStruct((BC, 1), jnp.float32)
        acc_spec = pl.BlockSpec((BC, 1), lambda s: (0, 0))
        dim_sems = (pltpu.ARBITRARY,)

    cost = pl.CostEstimate(flops=int(4 * BC * S), transcendentals=0,
                           bytes_accessed=int(2 * BC * S * itemsize + 3 * BC * 4))

    gsum, num, psum = pl.pallas_call(
        kernel,
        out_shape=(acc_shape, acc_shape, acc_shape),
        grid_spec=pltpu.PrefetchScalarGridSpec(
            num_scalar_prefetch=0,
            grid=grid,
            in_specs=[in_spec, in_spec],
            out_specs=[acc_spec, acc_spec, acc_spec],
        ),
        compiler_params=pltpu.CompilerParams(
            dimension_semantics=dim_sems,
            vmem_limit_bytes=vmem_limit),
        cost_estimate=cost,
    )(p_f, g_f)

    if n_cores > 1:
        gsum = gsum.sum(axis=0)
        num = num.sum(axis=0)
        psum = psum.sum(axis=0)
    return gsum.reshape(-1), num.reshape(-1), psum.reshape(-1)


def frequency_weighted_dice_loss(p, g, *, smooth=1e-5, max_tile_elems=None):
    """p, g: (B, C, *spatial). FrequencyWeightedDiceLoss with batchDice=False."""
    assert g.shape == p.shape
    B, C = p.shape[0], p.shape[1]
    S = 1
    for d in p.shape[2:]:
        S *= d
    BC = B * C

    # Stream in native dtype (kernel upcasts to f32); no jnp.pad copy needed.
    p_f = p.reshape(BC, S)
    g_f = g.reshape(BC, S)

    n_cores, vmem_cap = _tpu_params()
    kw = dict(BC=BC, S=S, vmem_cap=vmem_cap, max_tile_elems=max_tile_elems)
    if n_cores > 1:
        try:  # core-parallel 2-TC plan; fall back to 1-core plan if it rejects
            sums = jax.block_until_ready(
                _sums_pallas(p_f, g_f, n_cores=n_cores, **kw))
        except Exception:
            sums = _sums_pallas(p_f, g_f, n_cores=1, **kw)
    else:
        sums = _sums_pallas(p_f, g_f, n_cores=1, **kw)
    gsum, num, psum = sums

    # Tiny O(B*C) finalize in plain JAX.
    gsum = gsum.reshape(B, C)
    num = num.reshape(B, C)
    psum = psum.reshape(B, C)
    den = psum + gsum
    w = jnp.roll(gsum, 1, axis=1) + jnp.roll(gsum, -1, axis=1)
    w = w / gsum.sum(axis=-1, keepdims=True) / 2.0
    dice = (2.0 * num + smooth) / (den + smooth)
    # TODO(synk): original forward has a host-side `print(w)` side effect; omitted.
    return (w * (1.0 - dice)).sum()


def _reference(p, g, smooth=1e-5):
    sum_dims = tuple(range(2, p.ndim))
    w = (jnp.roll(g, 1, axis=1) + jnp.roll(g, -1, axis=1)).sum(axis=sum_dims)
    w = w / g.sum(axis=sum_dims).sum(axis=-1, keepdims=True) / 2.0
    num = (p * g).sum(axis=sum_dims)
    den = (p + g).sum(axis=sum_dims)
    dice = (2.0 * num + smooth) / (den + smooth)
    return (w * (1.0 - dice)).sum()


if __name__ == "__main__":
    key = jax.random.PRNGKey(0)
    kp, kg, kp2, kg2 = jax.random.split(key, 4)

    # Test 1: canonical shapes (lane-aligned spatial extent).
    B, C, H, W = 2, 4, 16, 16
    p = jax.nn.softmax(jax.random.normal(kp, (B, C, H, W), jnp.float32), axis=1)
    g = jax.nn.one_hot(jax.random.randint(kg, (B, H, W), 0, C), C,
                       dtype=jnp.float32).transpose(0, 3, 1, 2)
    loss = jax.block_until_ready(frequency_weighted_dice_loss(p, g))
    ref = _reference(p, g)
    assert jnp.allclose(loss, ref, rtol=1e-4, atol=1e-5), (loss, ref)

    # Test 2: ragged spatial extent + forced small tiles to exercise the
    # in-kernel last-tile masking path (replaces the old jnp.pad).
    B2, C2, H2, W2 = 2, 3, 9, 15
    p2 = jax.nn.softmax(jax.random.normal(kp2, (B2, C2, H2, W2), jnp.float32), axis=1)
    g2 = jax.nn.one_hot(jax.random.randint(kg2, (B2, H2, W2), 0, C2), C2,
                        dtype=jnp.float32).transpose(0, 3, 1, 2)
    loss2 = jax.block_until_ready(
        frequency_weighted_dice_loss(p2, g2, max_tile_elems=128))
    ref2 = _reference(p2, g2)
    assert jnp.allclose(loss2, ref2, rtol=1e-4, atol=1e-5), (loss2, ref2)

    print("KERNEL_OK")
</pallas_src>

<mosaic_0001>
module attributes {stable_mosaic.version = 11 : i64} {
  func.func @kernel(%arg0: i32, %arg1: memref<8x256xf32, #tpu.memory_space<vmem>>, %arg2: memref<8x256xf32, #tpu.memory_space<vmem>>, %arg3: memref<8x1xf32, #tpu.memory_space<vmem>>, %arg4: memref<8x1xf32, #tpu.memory_space<vmem>>, %arg5: memref<8x1xf32, #tpu.memory_space<vmem>>) attributes {dimension_semantics = [#tpu.dimension_semantics<arbitrary>], iteration_bounds = array<i64: 1>, scalar_prefetch = 0 : i64, scratch_operands = 0 : i64, tpu.core_type = #tpu.core_type<tc>, window_params = [{transform_indices = @transform_0, window_bounds = array<i64: 8, 256>}, {transform_indices = @transform_1, window_bounds = array<i64: 8, 256>}, {pipeline_mode = #tpu.pipeline_mode<synchronous>, transform_indices = @transform_2, window_bounds = array<i64: 8, 1>}, {pipeline_mode = #tpu.pipeline_mode<synchronous>, transform_indices = @transform_3, window_bounds = array<i64: 8, 1>}, {pipeline_mode = #tpu.pipeline_mode<synchronous>, transform_indices = @transform_4, window_bounds = array<i64: 8, 1>}]} {
    %c0_i32 = arith.constant 0 : i32
    %0 = arith.cmpi eq, %arg0, %c0_i32 : i32
    %1 = arith.extui %0 : i1 to i32
    %c0_i32_0 = arith.constant 0 : i32
    %2 = arith.cmpi ne, %1, %c0_i32_0 : i32
    scf.if %2 {
      %cst_18 = arith.constant 0.000000e+00 : f32
      %21 = vector.broadcast %cst_18 : f32 to vector<8x1xf32>
      %c0_19 = arith.constant 0 : index
      %c0_20 = arith.constant 0 : index
      %22 = vector.load %arg3[%c0_19, %c0_20] : memref<8x1xf32, #tpu.memory_space<vmem>>, vector<8x1xf32>
      tpu.vector_store %arg3[%c0_19, %c0_20], %21 {strides = array<i32>} : memref<8x1xf32, #tpu.memory_space<vmem>>, vector<8x1xf32>,
      %cst_21 = arith.constant 0.000000e+00 : f32
      %23 = vector.broadcast %cst_21 : f32 to vector<8x1xf32>
      %c0_22 = arith.constant 0 : index
      %c0_23 = arith.constant 0 : index
      %24 = vector.load %arg4[%c0_22, %c0_23] : memref<8x1xf32, #tpu.memory_space<vmem>>, vector<8x1xf32>
      tpu.vector_store %arg4[%c0_22, %c0_23], %23 {strides = array<i32>} : memref<8x1xf32, #tpu.memory_space<vmem>>, vector<8x1xf32>,
      %cst_24 = arith.constant 0.000000e+00 : f32
      %25 = vector.broadcast %cst_24 : f32 to vector<8x1xf32>
      %c0_25 = arith.constant 0 : index
      %c0_26 = arith.constant 0 : index
      %26 = vector.load %arg5[%c0_25, %c0_26] : memref<8x1xf32, #tpu.memory_space<vmem>>, vector<8x1xf32>
      tpu.vector_store %arg5[%c0_25, %c0_26], %25 {strides = array<i32>} : memref<8x1xf32, #tpu.memory_space<vmem>>, vector<8x1xf32>,
    } else {
    }
    %c0 = arith.constant 0 : index
    %c0_1 = arith.constant 0 : index
    %3 = vector.load %arg1[%c0, %c0_1] : memref<8x256xf32, #tpu.memory_space<vmem>>, vector<8x256xf32>
    %c0_2 = arith.constant 0 : index
    %c0_3 = arith.constant 0 : index
    %4 = vector.load %arg2[%c0_2, %c0_3] : memref<8x256xf32, #tpu.memory_space<vmem>>, vector<8x256xf32>
    %c0_4 = arith.constant 0 : index
    %c0_5 = arith.constant 0 : index
    %5 = vector.load %arg3[%c0_4, %c0_5] : memref<8x1xf32, #tpu.memory_space<vmem>>, vector<8x1xf32>
    %cst = arith.constant dense<0.000000e+00> : vector<8xf32>
    %6 = vector.multi_reduction <add>, %4, %cst [1] : vector<8x256xf32> to vector<8xf32>
    %7 = vector.shape_cast %6 : vector<8xf32> to vector<8x1xf32>
    %8 = arith.addf %5, %7 : vector<8x1xf32>
    %c0_6 = arith.constant 0 : index
    %c0_7 = arith.constant 0 : index
    %9 = vector.load %arg3[%c0_6, %c0_7] : memref<8x1xf32, #tpu.memory_space<vmem>>, vector<8x1xf32>
    tpu.vector_store %arg3[%c0_6, %c0_7], %8 {strides = array<i32>} : memref<8x1xf32, #tpu.memory_space<vmem>>, vector<8x1xf32>,
    %c0_8 = arith.constant 0 : index
    %c0_9 = arith.constant 0 : index
    %10 = vector.load %arg4[%c0_8, %c0_9] : memref<8x1xf32, #tpu.memory_space<vmem>>, vector<8x1xf32>
    %11 = arith.mulf %3, %4 : vector<8x256xf32>
    %cst_10 = arith.constant dense<0.000000e+00> : vector<8xf32>
    %12 = vector.multi_reduction <add>, %11, %cst_10 [1] : vector<8x256xf32> to vector<8xf32>
    %13 = vector.shape_cast %12 : vector<8xf32> to vector<8x1xf32>
    %14 = arith.addf %10, %13 : vector<8x1xf32>
    %c0_11 = arith.constant 0 : index
    %c0_12 = arith.constant 0 : index
    %15 = vector.load %arg4[%c0_11, %c0_12] : memref<8x1xf32, #tpu.memory_space<vmem>>, vector<8x1xf32>
    tpu.vector_store %arg4[%c0_11, %c0_12], %14 {strides = array<i32>} : memref<8x1xf32, #tpu.memory_space<vmem>>, vector<8x1xf32>,
    %c0_13 = arith.constant 0 : index
    %c0_14 = arith.constant 0 : index
    %16 = vector.load %arg5[%c0_13, %c0_14] : memref<8x1xf32, #tpu.memory_space<vmem>>, vector<8x1xf32>
    %cst_15 = arith.constant dense<0.000000e+00> : vector<8xf32>
    %17 = vector.multi_reduction <add>, %3, %cst_15 [1] : vector<8x256xf32> to vector<8xf32>
    %18 = vector.shape_cast %17 : vector<8xf32> to vector<8x1xf32>
    %19 = arith.addf %16, %18 : vector<8x1xf32>
    %c0_16 = arith.constant 0 : index
    %c0_17 = arith.constant 0 : index
    %20 = vector.load %arg5[%c0_16, %c0_17] : memref<8x1xf32, #tpu.memory_space<vmem>>, vector<8x1xf32>
    tpu.vector_store %arg5[%c0_16, %c0_17], %19 {strides = array<i32>} : memref<8x1xf32, #tpu.memory_space<vmem>>, vector<8x1xf32>,
    return
  }
  func.func @transform_0(%arg0: i32) -> (i32, i32) {
    %c0_i32 = arith.constant 0 : i32
    %c0_i32_0 = arith.constant 0 : i32
    return %c0_i32, %arg0 : i32, i32
  }
  func.func @transform_1(%arg0: i32) -> (i32, i32) {
    %c0_i32 = arith.constant 0 : i32
    %c0_i32_0 = arith.constant 0 : i32
    return %c0_i32, %arg0 : i32, i32
  }
  func.func @transform_2(%arg0: i32) -> (i32, i32) {
    %c0_i32 = arith.constant 0 : i32
    %c0_i32_0 = arith.constant 0 : i32
    %c0_i32_1 = arith.constant 0 : i32
    return %c0_i32, %c0_i32_0 : i32, i32
  }
  func.func @transform_3(%arg0: i32) -> (i32, i32) {
    %c0_i32 = arith.constant 0 : i32
    %c0_i32_0 = arith.constant 0 : i32
    %c0_i32_1 = arith.constant 0 : i32
    return %c0_i32, %c0_i32_0 : i32, i32
  }
  func.func @transform_4(%arg0: i32) -> (i32, i32) {
    %c0_i32 = arith.constant 0 : i32
    %c0_i32_0 = arith.constant 0 : i32
    %c0_i32_1 = arith.constant 0 : i32
    return %c0_i32, %c0_i32_0 : i32, i32
  }
}

</mosaic_0001>

<bundles_post_ra>
// kernel: tpu_custom_call.1
= control target key start
LH: loop header
LB: loop body
LE: loop exit
PB: predicated region body
PF: predicated region fallthrough
CT: control target
= control target key end

     0   :  { %10 = vsyncpa [#allocation3], 0  ;;  %s211_s0 = inlined_call_operand.hbm [shape: f32[8,256], index: 0, kind: input, shape index: {}]   ;;  %s212_s1 = inlined_call_operand.hbm [shape: f32[8,256], index: 1, kind: input, shape index: {}]   ;;  %s213_s2 = inlined_call_operand.vmem [shape: f32[8,1], index: 2, kind: output, shape index: {0}]   ;;  %s214_s3 = inlined_call_operand.vmem [shape: f32[8,1], index: 3, kind: output, shape index: {1}]   ;;  %s215_s4 = inlined_call_operand.vmem [shape: f32[8,1], index: 4, kind: output, shape index: {2}]  }
   0x1   :  { %s17_s17 = sshll.u32 %s211_s0, 4  ;;  %s18_s17 = int_to_ptr.hbm [resolvable:$true] %s17_s17 }
   0x2   :  { %11 = vsyncpa [#allocation5], 0  ;;  %s144_s18 = smov [#allocation2]   ;;  %s28_s22 = sshll.u32 %s212_s1, 4  ;;  %s29_s22 = int_to_ptr.hbm [resolvable:$true] %s28_s22 }
   0x3   :  { %s19_s19 = sshll.u32 %s144_s18, 4  ;;  %s145_s23 = smov [#allocation4]   ;;  %s20_s19 = int_to_ptr.vmem [resolvable:$true] %s19_s19 }
   0x4   :  { %22 = dma.hbm_to_vmem [thread:$0]  %s18_s17, 256, %s20_s19, [#allocation3]  }
   0x5   :  { %s30_s24 = sshll.u32 %s145_s23, 4  ;;  %s31_s24 = int_to_ptr.vmem [resolvable:$true] %s30_s24 }
   0x6   :  { %33 = dma.hbm_to_vmem [thread:$0]  %s29_s22, 256, %s31_s24, [#allocation5]  }
   0x7   :  { %140 = dma.done.wait [#allocation3], 256  }
   0x8   :  { %141 = vsyncadd [#allocation3], 4294967040 }
   0x9   :  { %142 = dma.done.wait [#allocation5], 256  }
   0xa   :  { %143 = vsyncadd [#allocation5], 4294967040  ;;  %vm46_vm0 = vcmask 7168   ;;  %v146_v0 = vmov 0.0   ;;  %v52_v1 = vld [vmem:[#allocation4] sm:$0xff]  ;;  %v53_v2 = vld [vmem:[#allocation4 + $0x8] sm:$0xff] }
   0xb   :  { %47 = vst.msk [vmem:[%s213_s2] sm:$0xff] %vm46_vm0, %v146_v0  ;;  %v50_v3 = vld [vmem:[#allocation2] sm:$0xff]  ;;  %v55_v4 = vadd.f32 %v53_v2, %v52_v1  ;;  %v51_v5 = vld [vmem:[#allocation2 + $0x8] sm:$0xff] }
   0xc   :  { %48 = vst.msk [vmem:[%s214_s3] sm:$0xff] %vm46_vm0, %v146_v0  ;;  %v70_v6 = vadd.f32 %v51_v5, %v50_v3  ;;  %v63_v7 = vmul.f32 %v53_v2, %v51_v5  ;;  %v62_v8 = vmul.f32 %v52_v1, %v50_v3 }
   0xd   :  { %49 = vst.msk [vmem:[%s215_s4] sm:$0xff] %vm46_vm0, %v146_v0  ;;  %56 = vadd.xlane.f32.xlu0 %v55_v4 }
   0xe   :  { %71 = vadd.xlane.f32.xlu1 %v70_v6  ;;  %v64_v9 = vadd.f32 %v63_v7, %v62_v8 }
  0x12   :  { %v54_v10 = vld [vmem:[%s213_s2] sm:$0xff] }
  0x13   :  { %v61_v16 = vld [vmem:[%s214_s3] sm:$0xff] }
  0x14   :  { %v69_v11 = vld [vmem:[%s215_s4] sm:$0xff] }
  0x15   :  { %65 = vadd.xlane.f32.xlu0 %v64_v9 }
  0x80   :  { %v57_v12 = vpop.xlane.xlu0 %56 }
  0x81   :  { %v58_v13 = vadd.f32 %v57_v12, %v54_v10  ;;  %v72_v14 = vpop.xlane.xlu1 %71 }
  0x82   :  { %v73_v15 = vadd.f32 %v72_v14, %v69_v11 }
  0x83   :  { %60 = vst.msk [vmem:[%s213_s2] sm:$0xff] %vm46_vm0, %v58_v13 }
  0x84   :  { %74 = vst.msk [vmem:[%s215_s4] sm:$0xff] %vm46_vm0, %v73_v15 }
  0x88   :  { %v66_v17 = vpop.xlane.xlu0 %65 }
  0x89   :  { %v67_v18 = vadd.f32 %v66_v17, %v61_v16 }
  0x8b   :  { %68 = vst.msk [vmem:[%s214_s3] sm:$0xff] %vm46_vm0, %v67_v18 }
  0x8c   :  { %87 = vsyncpa [#allocation3], 1 }
  0x8d   :  { %88 = vsyncpa [#allocation5], 1 }

</bundles_post_ra>
